<compile_context>
chip_gen: v7x
topology: tpu7x:2x2x1
jax: 0.10.0
libtpu: 0.0.40
codegen_flags: <defaults>
</compile_context>

<pallas_src>
import functools
import math

import jax
import jax.numpy as jnp
import numpy as np
from jax.experimental import pallas as pl
from jax.experimental.pallas import tpu as pltpu


_CPARAMS = pltpu.CompilerParams(
    dimension_semantics=("parallel",),
    vmem_limit_bytes=32 * 1024 * 1024,
)


# -----------------------------------------------------------------------------
# helpers
# -----------------------------------------------------------------------------
def _positional_encoding(d_model, max_len=50):
    pe = np.zeros((max_len, d_model), dtype=np.float32)
    position = np.arange(max_len, dtype=np.float32)[:, None]
    div_term = np.exp(np.arange(0, d_model, 2, dtype=np.float32)
                      * -(math.log(10000.0) / d_model))
    pe[:, 0::2] = np.sin(position * div_term)
    pe[:, 1::2] = np.cos(position * div_term)
    return jnp.asarray(pe)


def _choose_tile(rows, cap):
    """Row tile: <= cap, multiple of 8 when tiling (satisfies the (8,128) rule),
    and small enough that the grid has >= 2 steps when possible so the
    ("parallel",) axis can use both v7x TensorCores.  Ragged last blocks are
    handled by Pallas edge masking — no wrapper-side padding."""
    if rows <= 8:
        return rows                       # one full block (full-dim rule)
    if rows <= cap:
        half = (((rows + 1) // 2) + 7) // 8 * 8
        return min(half, cap)
    return cap


# -----------------------------------------------------------------------------
# 'concat' fusion: Linear(F*C -> C) on cat(features)  ==  sum_f x_f @ W_f^T + b
# -----------------------------------------------------------------------------
def _concat_kernel(*refs, feature_num):
    feats = refs[:feature_num]
    w_ref, b_ref, o_ref = refs[feature_num:]
    # bf16 MXU operands (in-kernel cast of resident VMEM tiles), f32 accumulate.
    acc = jnp.dot(feats[0][...].astype(jnp.bfloat16), w_ref[0],
                  preferred_element_type=jnp.float32)
    for f in range(1, feature_num):
        acc = acc + jnp.dot(feats[f][...].astype(jnp.bfloat16), w_ref[f],
                            preferred_element_type=jnp.float32)
    o_ref[...] = acc + b_ref[...]


def concat_fusion(features, w_fcc, b_row):
    lead = features[0].shape[:-1]
    C = features[0].shape[-1]
    F = len(features)
    M = int(np.prod(lead))
    flat = [f.reshape(M, C) for f in features]
    tm = _choose_tile(M, 512)

    out = pl.pallas_call(
        functools.partial(_concat_kernel, feature_num=F),
        out_shape=jax.ShapeDtypeStruct((M, C), jnp.float32),
        grid=(pl.cdiv(M, tm),),
        in_specs=[pl.BlockSpec((tm, C), lambda i: (i, 0)) for _ in range(F)]
                 + [pl.BlockSpec((F, C, C), lambda i: (0, 0, 0)),
                    pl.BlockSpec((1, C), lambda i: (0, 0))],
        out_specs=pl.BlockSpec((tm, C), lambda i: (i, 0)),
        compiler_params=_CPARAMS,
    )(*flat, w_fcc, b_row)
    return out.reshape(*lead, C)


# -----------------------------------------------------------------------------
# 'weighted' fusion: sum_f weights[f] * feature_f  (purely elementwise)
# -----------------------------------------------------------------------------
def _weighted_kernel(*refs, feature_num):
    w_ref = refs[0]                        # SMEM (F,)
    feats = refs[1:1 + feature_num]
    o_ref = refs[1 + feature_num]
    acc = w_ref[0] * feats[0][...]
    for f in range(1, feature_num):
        acc = acc + w_ref[f] * feats[f][...]
    o_ref[...] = acc


def weighted_fusion(features, weights):
    lead = features[0].shape[:-1]
    C = features[0].shape[-1]
    F = len(features)
    M = int(np.prod(lead))
    flat = [f.reshape(M, C) for f in features]

    # lane-dense relayout when C < 128 (elementwise op -> pure layout plumbing;
    # avoids masked sub-128-lane loads/stores — the measured 4.5x store lever)
    if C % 128 != 0 and (M * C) % 128 == 0:
        R, W = (M * C) // 128, 128
        flat = [f.reshape(R, W) for f in flat]
    else:
        R, W = M, C

    tm = _choose_tile(R, 1024)

    out = pl.pallas_call(
        functools.partial(_weighted_kernel, feature_num=F),
        out_shape=jax.ShapeDtypeStruct((R, W), jnp.float32),
        grid=(pl.cdiv(R, tm),),
        in_specs=[pl.BlockSpec(memory_space=pltpu.MemorySpace.SMEM)]
                 + [pl.BlockSpec((tm, W), lambda i: (i, 0)) for _ in range(F)],
        out_specs=pl.BlockSpec((tm, W), lambda i: (i, 0)),
        compiler_params=_CPARAMS,
    )(weights, *flat)
    return out.reshape(*lead, C)


# -----------------------------------------------------------------------------
# 'self_attention' / 'self_attention_residual' fusion
#   Stack features along a length-F "sequence", add sinusoidal PE, 8-head
#   self-attention, (optional residual with PRE-PE features), LayerNorm, take
#   sequence position 0.  Only the position-0 query row is used, so the kernel
#   computes exactly that row.  F is a small static constant, so all F per-head
#   scores are produced first, one softmax, then one weighted-V accumulation.
#   Per-head reductions / broadcasts go through small MXU matmuls against
#   precomputed head-indicator matrices (no lane masks, no XLU reductions).
# -----------------------------------------------------------------------------
def _attn_fusion_kernel(*args, feature_num, num_heads, residual):
    F = feature_num
    feat_refs = args[:F]
    (pe_ref, wqkv_ref, bqkv_ref, wkv_ref, bkv_ref, wo_ref, bo_ref,
     ind_ref, indt_ref, g_ref, beta_ref, o_ref) = args[F:]
    C = o_ref.shape[-1]
    H = num_heads
    Dh = C // H
    scale = 1.0 / math.sqrt(Dh)

    ind = ind_ref[...]           # (C, H): ind[c, h] = 1  iff  c // Dh == h
    ind_t = indt_ref[...]        # (H, C)

    # position 0: fused Q/K/V projection — one (tm, C) @ (C, 3C) MXU issue
    f0 = feat_refs[0][...]
    x0 = f0 + pe_ref[0:1, :]
    qkv0 = (jnp.dot(x0, wqkv_ref[...], preferred_element_type=jnp.float32)
            + bqkv_ref[...])
    q0 = qkv0[:, :C]
    scores = [scale * jnp.dot(q0 * qkv0[:, C:2 * C], ind,
                              preferred_element_type=jnp.float32)]    # (tm, H)
    values = [qkv0[:, 2 * C:]]

    # remaining sequence positions: fused K/V projection + per-head score
    for s in range(1, F):
        x_s = feat_refs[s][...] + pe_ref[s:s + 1, :]
        kv = (jnp.dot(x_s, wkv_ref[...], preferred_element_type=jnp.float32)
              + bkv_ref[...])
        scores.append(scale * jnp.dot(q0 * kv[:, :C], ind,
                                      preferred_element_type=jnp.float32))
        values.append(kv[:, C:])

    # plain softmax over the F positions (no online-softmax rescaling needed)
    m = scores[0]
    for s in range(1, F):
        m = jnp.maximum(m, scores[s])
    probs = [jnp.exp(sc - m) for sc in scores]
    l = probs[0]
    for s in range(1, F):
        l = l + probs[s]
    inv_l = pl.reciprocal(l, approx=True)          # EUP slot, effectively free

    # context: per-head broadcast of normalized probs via (tm,H) @ (H,C) matmul
    ctx = jnp.dot(probs[0] * inv_l, ind_t,
                  preferred_element_type=jnp.float32) * values[0]
    for s in range(1, F):
        ctx = ctx + jnp.dot(probs[s] * inv_l, ind_t,
                            preferred_element_type=jnp.float32) * values[s]

    out = jnp.dot(ctx, wo_ref[...], preferred_element_type=jnp.float32) + bo_ref[...]
    if residual:
        out = out + f0                 # residual uses the PRE-PE feature (spec)

    # LayerNorm over feature_dim, single pass (E[x], E[x^2])
    mu = jnp.mean(out, axis=-1, keepdims=True)
    msq = jnp.mean(out * out, axis=-1, keepdims=True)
    var = msq - mu * mu
    o_ref[...] = ((out - mu) * jax.lax.rsqrt(var + 1e-5)) * g_ref[...] + beta_ref[...]


def attention_fusion(features, params, residual):
    NT, V, C = features[0].shape
    F = len(features)
    M = NT * V
    flat = [f.reshape(M, C) for f in features]
    tm = _choose_tile(M, 256)

    consts = [params["pe_f"], params["wqkv_t"], params["bqkv_row"],
              params["wkv_t"], params["bkv_row"], params["wo_t"],
              params["bo_row"], params["ind"], params["ind_t"],
              params["ln_g_row"], params["ln_b_row"]]

    def const_spec(arr):
        nd = arr.ndim
        return pl.BlockSpec(arr.shape, lambda i, _nd=nd: (0,) * _nd)

    out = pl.pallas_call(
        functools.partial(_attn_fusion_kernel, feature_num=F, num_heads=8,
                          residual=residual),
        out_shape=jax.ShapeDtypeStruct((M, C), jnp.float32),
        grid=(pl.cdiv(M, tm),),
        in_specs=[pl.BlockSpec((tm, C), lambda i: (i, 0)) for _ in range(F)]
                 + [const_spec(a) for a in consts],
        out_specs=pl.BlockSpec((tm, C), lambda i: (i, 0)),
        compiler_params=_CPARAMS,
    )(*flat, *consts)
    return out.reshape(NT, V, C)


# -----------------------------------------------------------------------------
# MultiFeatureFusion module (parameters initialized deterministically in-script;
# weight transposes / packings / bf16 casts / bias reshapes hoisted to __init__)
# -----------------------------------------------------------------------------
class MultiFeatureFusion:
    def __init__(self, fusion_type, feature_dim, feature_num, key):
        self.fusion_type = fusion_type
        self.feature_dim = feature_dim
        self.feature_num = feature_num
        C, F = feature_dim, feature_num
        keys = jax.random.split(key, 4)
        if fusion_type == "concat":
            w = 0.05 * jax.random.normal(keys[0], (C, F * C), jnp.float32)
            b = 0.05 * jax.random.normal(keys[1], (C,), jnp.float32)
            self.params = {
                "w": w, "b": b,
                # pre-transposed per-feature weight slabs, pre-cast to bf16
                "w_fcc": w.T.reshape(F, C, C).astype(jnp.bfloat16),
                "b_row": b.reshape(1, C),
            }
        elif fusion_type == "weighted":
            self.params = {"weights": jnp.ones((F,), jnp.float32) / F}
        elif fusion_type in ("self_attention", "self_attention_residual"):
            assert C % 8 == 0, "feature_dim must be divisible by num_heads=8"
            H = 8
            Dh = C // H
            in_proj_w = 0.05 * jax.random.normal(keys[0], (3 * C, C), jnp.float32)
            in_proj_b = 0.05 * jax.random.normal(keys[1], (3 * C,), jnp.float32)
            wq, wk, wv = in_proj_w[:C], in_proj_w[C:2 * C], in_proj_w[2 * C:]
            bq, bk, bv = in_proj_b[:C], in_proj_b[C:2 * C], in_proj_b[2 * C:]
            wo = 0.05 * jax.random.normal(keys[2], (C, C), jnp.float32)
            bo = 0.05 * jax.random.normal(keys[3], (C,), jnp.float32)
            pe = _positional_encoding(C, max_len=50)
            ind = (np.arange(C)[:, None] // Dh
                   == np.arange(H)[None, :]).astype(np.float32)       # (C, H)
            self.params = {
                # raw (used by the pure-JAX reference)
                "wq": wq, "wk": wk, "wv": wv, "bq": bq, "bk": bk, "bv": bv,
                "wo": wo, "bo": bo,
                "ln_g": jnp.ones((C,), jnp.float32),
                "ln_b": jnp.zeros((C,), jnp.float32),
                "pe": pe,
                # pre-packed for the kernel
                "wqkv_t": jnp.concatenate([wq.T, wk.T, wv.T], axis=1),  # (C, 3C)
                "bqkv_row": jnp.concatenate([bq, bk, bv]).reshape(1, 3 * C),
                "wkv_t": jnp.concatenate([wk.T, wv.T], axis=1),          # (C, 2C)
                "bkv_row": jnp.concatenate([bk, bv]).reshape(1, 2 * C),
                "wo_t": wo.T, "bo_row": bo.reshape(1, C),
                "ln_g_row": jnp.ones((1, C), jnp.float32),
                "ln_b_row": jnp.zeros((1, C), jnp.float32),
                "pe_f": pe[:F],
                "ind": jnp.asarray(ind),                                  # (C, H)
                "ind_t": jnp.asarray(ind.T),                              # (H, C)
            }
        else:
            raise ValueError(f"[ERROR] Fusion type {fusion_type} does not exist.")

    def __call__(self, *features):
        if self.fusion_type == "concat":
            return concat_fusion(list(features), self.params["w_fcc"],
                                 self.params["b_row"])
        if self.fusion_type == "weighted":
            return weighted_fusion(list(features), self.params["weights"])
        return attention_fusion(
            list(features), self.params,
            residual=(self.fusion_type == "self_attention_residual"))


# -----------------------------------------------------------------------------
# pure-JAX references (for correctness check)
# -----------------------------------------------------------------------------
def _ref_concat(features, w, b):
    return jnp.concatenate(features, axis=-1) @ w.T + b


def _ref_weighted(features, weights):
    return jnp.sum(weights * jnp.stack(features, axis=-1), axis=-1)


def _ref_attention(features, params, residual):
    NT, V, C = features[0].shape
    F = len(features)
    M = NT * V
    x = jnp.stack([f.reshape(M, C) for f in features], axis=1)      # (M, F, C)
    xp = x + params["pe"][None, :F, :]
    q = xp @ params["wq"].T + params["bq"]
    k = xp @ params["wk"].T + params["bk"]
    v = xp @ params["wv"].T + params["bv"]
    H, Dh = 8, C // 8
    qh = q.reshape(M, F, H, Dh).transpose(0, 2, 1, 3)
    kh = k.reshape(M, F, H, Dh).transpose(0, 2, 1, 3)
    vh = v.reshape(M, F, H, Dh).transpose(0, 2, 1, 3)
    scores = jnp.einsum("mhqd,mhkd->mhqk", qh, kh) / math.sqrt(Dh)
    p = jax.nn.softmax(scores, axis=-1)
    ctx = jnp.einsum("mhqk,mhkd->mhqd", p, vh)
    ctx = ctx.transpose(0, 2, 1, 3).reshape(M, F, C)
    out = ctx @ params["wo"].T + params["bo"]
    if residual:
        out = out + x
    mu = out.mean(-1, keepdims=True)
    var = ((out - mu) ** 2).mean(-1, keepdims=True)
    outn = (out - mu) / jnp.sqrt(var + 1e-5)
    outn = outn * params["ln_g"] + params["ln_b"]
    return outn[:, 0, :].reshape(NT, V, C)


# -----------------------------------------------------------------------------
if __name__ == "__main__":
    key = jax.random.PRNGKey(0)
    NT, V, C, F = 2, 4, 32, 3                      # small shapes; rows = NT*V = 8
    k_feat, k_mod = jax.random.split(key)
    feat_keys = jax.random.split(k_feat, F)
    features = [jax.random.normal(feat_keys[i], (NT, V, C), jnp.float32)
                for i in range(F)]

    fusion_types = ("concat", "weighted", "self_attention", "self_attention_residual")
    for idx, ftype in enumerate(fusion_types):
        module = MultiFeatureFusion(ftype, C, F, jax.random.fold_in(k_mod, idx))
        out = jax.block_until_ready(module(*features))
        assert out.shape == (NT, V, C), (ftype, out.shape)

        if ftype == "concat":
            ref = _ref_concat(features, module.params["w"], module.params["b"])
        elif ftype == "weighted":
            ref = _ref_weighted(features, module.params["weights"])
        else:
            ref = _ref_attention(features, module.params,
                                 residual=(ftype == "self_attention_residual"))
        err = float(jnp.max(jnp.abs(out - ref)))
        assert err < 1e-2, (ftype, err)

    print("KERNEL_OK")
</pallas_src>

<mosaic_0001>
module attributes {stable_mosaic.version = 11 : i64} {
  func.func @_concat_kernel(%arg0: i32, %arg1: memref<8x32xf32, #tpu.memory_space<vmem>>, %arg2: memref<8x32xf32, #tpu.memory_space<vmem>>, %arg3: memref<8x32xf32, #tpu.memory_space<vmem>>, %arg4: memref<3x32x32xbf16, #tpu.memory_space<vmem>>, %arg5: memref<1x32xf32, #tpu.memory_space<vmem>>, %arg6: memref<8x32xf32, #tpu.memory_space<vmem>>) attributes {dimension_semantics = [#tpu.dimension_semantics<parallel>], iteration_bounds = array<i64: 1>, scalar_prefetch = 0 : i64, scratch_operands = 0 : i64, tpu.core_type = #tpu.core_type<tc>, window_params = [{transform_indices = @transform_0, window_bounds = array<i64: 8, 32>}, {transform_indices = @transform_1, window_bounds = array<i64: 8, 32>}, {transform_indices = @transform_2, window_bounds = array<i64: 8, 32>}, {pipeline_mode = #tpu.pipeline_mode<synchronous>, transform_indices = @transform_3, window_bounds = array<i64: 3, 32, 32>}, {pipeline_mode = #tpu.pipeline_mode<synchronous>, transform_indices = @transform_4, window_bounds = array<i64: 1, 32>}, {transform_indices = @transform_5, window_bounds = array<i64: 8, 32>}]} {
    %c0 = arith.constant 0 : index
    %c0_0 = arith.constant 0 : index
    %0 = vector.load %arg1[%c0, %c0_0] : memref<8x32xf32, #tpu.memory_space<vmem>>, vector<8x32xf32>
    %1 = arith.truncf %0 : vector<8x32xf32> to vector<8x32xbf16>
    %c0_1 = arith.constant 0 : index
    %c0_2 = arith.constant 0 : index
    %c0_3 = arith.constant 0 : index
    %2 = vector.load %arg4[%c0_1, %c0_2, %c0_3] : memref<3x32x32xbf16, #tpu.memory_space<vmem>>, vector<1x32x32xbf16>
    %3 = vector.shape_cast %2 : vector<1x32x32xbf16> to vector<32x32xbf16>
    %cst = arith.constant dense<0.000000e+00> : vector<8x32xf32>
    %4 = tpu.matmul %1, %3, %cst {dimension_numbers = #tpu.dot_dimension_numbers<[1], [0], [0], [1], [0, 0, 1, 1], [], []>} : vector<8x32xbf16>, vector<32x32xbf16>, vector<8x32xf32> -> vector<8x32xf32>
    %c0_4 = arith.constant 0 : index
    %c0_5 = arith.constant 0 : index
    %5 = vector.load %arg2[%c0_4, %c0_5] : memref<8x32xf32, #tpu.memory_space<vmem>>, vector<8x32xf32>
    %6 = arith.truncf %5 : vector<8x32xf32> to vector<8x32xbf16>
    %c1 = arith.constant 1 : index
    %c0_6 = arith.constant 0 : index
    %c0_7 = arith.constant 0 : index
    %7 = vector.load %arg4[%c1, %c0_6, %c0_7] : memref<3x32x32xbf16, #tpu.memory_space<vmem>>, vector<1x32x32xbf16>
    %8 = vector.shape_cast %7 : vector<1x32x32xbf16> to vector<32x32xbf16>
    %cst_8 = arith.constant dense<0.000000e+00> : vector<8x32xf32>
    %9 = tpu.matmul %6, %8, %cst_8 {dimension_numbers = #tpu.dot_dimension_numbers<[1], [0], [0], [1], [0, 0, 1, 1], [], []>} : vector<8x32xbf16>, vector<32x32xbf16>, vector<8x32xf32> -> vector<8x32xf32>
    %10 = arith.addf %4, %9 : vector<8x32xf32>
    %c0_9 = arith.constant 0 : index
    %c0_10 = arith.constant 0 : index
    %11 = vector.load %arg3[%c0_9, %c0_10] : memref<8x32xf32, #tpu.memory_space<vmem>>, vector<8x32xf32>
    %12 = arith.truncf %11 : vector<8x32xf32> to vector<8x32xbf16>
    %c2 = arith.constant 2 : index
    %c0_11 = arith.constant 0 : index
    %c0_12 = arith.constant 0 : index
    %13 = vector.load %arg4[%c2, %c0_11, %c0_12] : memref<3x32x32xbf16, #tpu.memory_space<vmem>>, vector<1x32x32xbf16>
    %14 = vector.shape_cast %13 : vector<1x32x32xbf16> to vector<32x32xbf16>
    %cst_13 = arith.constant dense<0.000000e+00> : vector<8x32xf32>
    %15 = tpu.matmul %12, %14, %cst_13 {dimension_numbers = #tpu.dot_dimension_numbers<[1], [0], [0], [1], [0, 0, 1, 1], [], []>} : vector<8x32xbf16>, vector<32x32xbf16>, vector<8x32xf32> -> vector<8x32xf32>
    %16 = arith.addf %10, %15 : vector<8x32xf32>
    %c0_14 = arith.constant 0 : index
    %c0_15 = arith.constant 0 : index
    %17 = vector.load %arg5[%c0_14, %c0_15] : memref<1x32xf32, #tpu.memory_space<vmem>>, vector<1x32xf32>
    %18 = vector.broadcast %17 : vector<1x32xf32> to vector<8x32xf32>
    %19 = arith.addf %16, %18 : vector<8x32xf32>
    %c0_16 = arith.constant 0 : index
    %c0_17 = arith.constant 0 : index
    %20 = vector.load %arg6[%c0_16, %c0_17] : memref<8x32xf32, #tpu.memory_space<vmem>>, vector<8x32xf32>
    tpu.vector_store %arg6[%c0_16, %c0_17], %19 {strides = array<i32>} : memref<8x32xf32, #tpu.memory_space<vmem>>, vector<8x32xf32>,
    return
  }
  func.func @transform_0(%arg0: i32) -> (i32, i32) {
    %c0_i32 = arith.constant 0 : i32
    %c0_i32_0 = arith.constant 0 : i32
    return %arg0, %c0_i32 : i32, i32
  }
  func.func @transform_1(%arg0: i32) -> (i32, i32) {
    %c0_i32 = arith.constant 0 : i32
    %c0_i32_0 = arith.constant 0 : i32
    return %arg0, %c0_i32 : i32, i32
  }
  func.func @transform_2(%arg0: i32) -> (i32, i32) {
    %c0_i32 = arith.constant 0 : i32
    %c0_i32_0 = arith.constant 0 : i32
    return %arg0, %c0_i32 : i32, i32
  }
  func.func @transform_3(%arg0: i32) -> (i32, i32, i32) {
    %c0_i32 = arith.constant 0 : i32
    %c0_i32_0 = arith.constant 0 : i32
    %c0_i32_1 = arith.constant 0 : i32
    %c0_i32_2 = arith.constant 0 : i32
    return %c0_i32, %c0_i32_0, %c0_i32_1 : i32, i32, i32
  }
  func.func @transform_4(%arg0: i32) -> (i32, i32) {
    %c0_i32 = arith.constant 0 : i32
    %c0_i32_0 = arith.constant 0 : i32
    %c0_i32_1 = arith.constant 0 : i32
    return %c0_i32, %c0_i32_0 : i32, i32
  }
  func.func @transform_5(%arg0: i32) -> (i32, i32) {
    %c0_i32 = arith.constant 0 : i32
    %c0_i32_0 = arith.constant 0 : i32
    return %arg0, %c0_i32 : i32, i32
  }
}

</mosaic_0001>

<bundles_post_ra>
// kernel: tpu_custom_call.1
= control target key start
LH: loop header
LB: loop body
LE: loop exit
PB: predicated region body
PF: predicated region fallthrough
CT: control target
= control target key end

     0   :  { %10 = vsyncpa [#allocation3], 0  ;;  %s576_s0 = inlined_call_operand.hbm [shape: f32[8,32], index: 0, kind: input, shape index: {}]   ;;  %s577_s1 = inlined_call_operand.hbm [shape: f32[8,32], index: 1, kind: input, shape index: {}]   ;;  %s578_s2 = inlined_call_operand.hbm [shape: f32[8,32], index: 2, kind: input, shape index: {}]   ;;  %s579_s3 = inlined_call_operand.hbm [shape: bf16[3,32,32], index: 3, kind: input, shape index: {}]   ;;  %s580_s4 = inlined_call_operand.vmem [shape: f32[1,32], index: 4, kind: input, shape index: {}]   ;;  %s581_s5 = inlined_call_operand.hbm [shape: f32[8,32], index: 5, kind: output, shape index: {}]  }
   0x1   :  { %11 = vsyncpa [#allocation6], 0 }
   0x2   :  { %12 = vsyncpa [#allocation9], 0 }
   0x3   :  { %13 = vsyncpa [#allocation4], 0  ;;  %s460_s18 = smov [#allocation5]   ;;  %s461_s20 = smov [#allocation2]  }
   0x4   :  { %s30_s19 = sshll.u32 %s460_s18, 4  ;;  %s20_s21 = sshll.u32 %s461_s20, 4  ;;  %s31_s19 = int_to_ptr.vmem [resolvable:$true] %s30_s19  ;;  %s21_s21 = int_to_ptr.vmem [resolvable:$true] %s20_s21 }
   0x5   :  { %s342_s24 = scalar_lea.hbm %s577_s1, 128 }
   0x6   :  { %p343_p0 = scmp.ne.s32.totalorder %s577_s1, %s342_s24  ;;  %p346_p1 = scmp.lt.u32.totalorder %s342_s24, %s577_s1 }
   0x8   :  { %p348_p2 = pnand %p346_p1, %p343_p0 }
   0xa   :  { %351 = shalt.err (!%p348_p2)
}
   0xb   :  { %s352_s29 = scalar_lea.vmem %s31_s19, 128  ;;  %p357_p4 = scmp.lt.s32.totalorder %s31_s19, %s31_s19 }
   0xc   :  { %p353_p3 = scmp.ne.s32.totalorder %s31_s19, %s352_s29  ;;  %p358_p5 = scmp.lt.s32.totalorder %s352_s29, %s352_s29 }
   0xe   :  { %p359_p6 = por %p358_p5, %p357_p4 }
  0x10   :  { %p360_p7 = pnand %p359_p6, %p353_p3 }
  0x12   :  { %363 = shalt.err (!%p360_p7)
}
  0x13   :  { %33 = dma.hbm_to_vmem [thread:$0]  %s577_s1, 128, %s31_s19, [#allocation6]  }
  0x14   :  { %s364_s9 = scalar_lea.hbm %s576_s0, 128 }
  0x15   :  { %p365_p8 = scmp.ne.s32.totalorder %s576_s0, %s364_s9  ;;  %p368_p9 = scmp.lt.u32.totalorder %s364_s9, %s576_s0 }
  0x17   :  { %p370_p10 = pnand %p368_p9, %p365_p8 }
  0x19   :  { %373 = shalt.err (!%p370_p10)
}
  0x1a   :  { %s374_s14 = scalar_lea.vmem %s21_s21, 128  ;;  %p379_p12 = scmp.lt.s32.totalorder %s21_s21, %s21_s21 }
  0x1b   :  { %p375_p11 = scmp.ne.s32.totalorder %s21_s21, %s374_s14  ;;  %p380_p13 = scmp.lt.s32.totalorder %s374_s14, %s374_s14 }
  0x1d   :  { %p381_p0 = por %p380_p13, %p379_p12 }
  0x1f   :  { %p382_p1 = pnand %p381_p0, %p375_p11 }
  0x21   :  { %385 = shalt.err (!%p382_p1)
}
  0x22   :  { %23 = dma.hbm_to_vmem [thread:$0]  %s576_s0, 128, %s21_s21, [#allocation3]  }
  0x23   :  { %s462_s16 = smov [#allocation7]   ;;  %s463_s18 = smov [#allocation8]  }
  0x24   :  { %s40_s17 = sshll.u32 %s462_s16, 4  ;;  %s49_s19 = sshll.u32 %s463_s18, 4  ;;  %s41_s17 = int_to_ptr.vmem [resolvable:$true] %s40_s17  ;;  %s523_s19 = int_to_ptr.vmem [resolvable:$true] %s49_s19 }
  0x25   :  { %s386_s23 = scalar_lea.hbm %s578_s2, 128 }
  0x26   :  { %p387_p2 = scmp.ne.s32.totalorder %s578_s2, %s386_s23  ;;  %p390_p3 = scmp.lt.u32.totalorder %s386_s23, %s578_s2 }
  0x28   :  { %p392_p4 = pnand %p390_p3, %p387_p2 }
  0x2a   :  { %395 = shalt.err (!%p392_p4)
}
  0x2b   :  { %s396_s0 = scalar_lea.vmem %s41_s17, 128  ;;  %p401_p6 = scmp.lt.s32.totalorder %s41_s17, %s41_s17 }
  0x2c   :  { %p397_p5 = scmp.ne.s32.totalorder %s41_s17, %s396_s0  ;;  %p402_p7 = scmp.lt.s32.totalorder %s396_s0, %s396_s0 }
  0x2e   :  { %p403_p8 = por %p402_p7, %p401_p6 }
  0x30   :  { %p404_p9 = pnand %p403_p8, %p397_p5 }
  0x32   :  { %407 = shalt.err (!%p404_p9)
}
  0x33   :  { %43 = dma.hbm_to_vmem [thread:$0]  %s578_s2, 128, %s41_s17, [#allocation6]  }
  0x34   :  { %s408_s6 = scalar_lea.hbm %s579_s3, 768 }
  0x35   :  { %p409_p10 = scmp.ne.s32.totalorder %s579_s3, %s408_s6  ;;  %p412_p11 = scmp.lt.u32.totalorder %s408_s6, %s579_s3 }
  0x37   :  { %p414_p12 = pnand %p412_p11, %p409_p10 }
  0x39   :  { %417 = shalt.err (!%p414_p12)
}
  0x3a   :  { %s418_s11 = scalar_lea.vmem %s523_s19, 768  ;;  %p423_p0 = scmp.lt.s32.totalorder %s523_s19, %s523_s19 }
  0x3b   :  { %p419_p13 = scmp.ne.s32.totalorder %s523_s19, %s418_s11  ;;  %p424_p1 = scmp.lt.s32.totalorder %s418_s11, %s418_s11 }
  0x3d   :  { %p425_p2 = por %p424_p1, %p423_p0 }
  0x3f   :  { %p426_p3 = pnand %p425_p2, %p419_p13 }
  0x41   :  { %429 = shalt.err (!%p426_p3)
}
  0x42   :  { %s464_s2 = smov 64   ;;  %s465_s12 = smov 4  }
  0x43   :  { %55 = dma.hbm_to_vmem [thread:$0]  %s579_s3, 768, %s523_s19, [#allocation9], %s464_s2, %s464_s2, %s465_s12  }
  0x44   :  { %452 = dma.done.wait [#allocation3], 128  }
  0x45   :  { %453 = vsyncadd [#allocation3], 4294967168 }
  0x46   :  { %454 = dma.done.wait [#allocation6], 256  }
  0x47   :  { %455 = vsyncadd [#allocation6], 4294967040 }
  0x48   :  { %456 = dma.done.wait [#allocation9], 768  }
  0x49   :  { %457 = vsyncadd [#allocation9], 4294966528  ;;  %v466_v0 = vmov 0.0   ;;  %vm467_vm0 = vmmov 0   ;;  %v336_v1 = vld [vmem:[#allocation8 + $0x10] sm:$0xff]   ;;  %v337_v2 = vld [vmem:[#allocation8] sm:$0xff]  }
  0x4a   :  { %303 = vmatprep.subr.bf16.mxu0 %v466_v0  ;;  %311 = vmatprep.subr.bf16.mxu1 %v466_v0  ;;  %v338_v3 = vld [vmem:[#allocation8 + $0x18] sm:$0xff]   ;;  %v339_v4 = vld [vmem:[#allocation8 + $0x8] sm:$0xff]   ;;  %v77_v5 = vld [vmem:[#allocation5] sm:$0xff]  ;;  %vm96_vm1 = vcmask 261120   ;;  %s468_s15 = smov [#allocation10]  }
  0x4b   :  { %307 = vmatprep.mubr.msk.bf16.mxu0 %vm467_vm0, %v466_v0  ;;  %315 = vmatprep.mubr.msk.bf16.mxu1 %vm467_vm0, %v466_v0  ;;  %v71_v6 = vld [vmem:[#allocation2] sm:$0xff]  ;;  %v78_v7 = vpack.c.bf16 %v77_v5, %v77_v5  ;;  %v340_v9 = vld [vmem:[#allocation8 + $0x20] sm:$0xff]   ;;  %v195_v11 = vld [vmem:[#allocation7] sm:$0xff]  ;;  %s273_s16 = sshll.u32 %s468_s15, 4  ;;  %s274_s16 = int_to_ptr.vmem [resolvable:$true] %s273_s16 }
  0x4c   :  { %304 = vmatpush3.bf16.msra.mxu0 %v336_v1  ;;  %312 = vmatpush3.bf16.msra.mxu1 %v337_v2  ;;  %v72_v8 = vpack.c.bf16 %v71_v6, %v71_v6  ;;  %v341_v10 = vld [vmem:[#allocation8 + $0x28] sm:$0xff]   ;;  %v196_v12 = vpack.c.bf16 %v195_v11, %v195_v11  ;;  %s430_s17 = scalar_lea.vmem %s274_s16, 128  ;;  %p435_p5 = scmp.lt.s32.totalorder %s274_s16, %s274_s16 }
  0x4d   :  { %305 = vmatprep.subr.bf16.mxu0 %v466_v0  ;;  %313 = vmatprep.subr.bf16.mxu1 %v466_v0  ;;  %v293_v23 = vld [vmem:[%s580_s4] ss:$0 sm:$0xff]  ;;  %p431_p4 = scmp.ne.s32.totalorder %s274_s16, %s430_s17  ;;  %p436_p6 = scmp.lt.s32.totalorder %s430_s17, %s430_s17 }
  0x4f   :  { %p437_p7 = por %p436_p6, %p435_p5 }
  0x50   :  { %306 = vmatpush3.bf16.msra.mxu0 %v338_v3  ;;  %314 = vmatpush3.bf16.msra.mxu1 %v339_v4 }
  0x51   :  { %319 = vmatprep.subr.bf16.mxu0 %v466_v0  ;;  %p438_p8 = pnand %p437_p7, %p431_p4 }
  0x53   :  { %308 = vmatmul.mubr.msk.bf16.vlgmr.msra.gmra.mrb[0].mxu0 %vm96_vm1, %v78_v7  ;;  %316 = vmatmul.mubr.msk.bf16.vlgmr.msra.gmra.mrb[0].mxu1 %vm96_vm1, %v72_v8 }
  0x54   :  { %320 = vmatpush3.bf16.msra.mxu0 %v340_v9  ;;  %323 = vmatprep.mubr.msk.bf16.mxu0 %vm467_vm0, %v466_v0 }
  0x55   :  { %321 = vmatprep.subr.bf16.mxu0 %v466_v0 }
  0x58   :  { %322 = vmatpush3.bf16.msra.mxu0 %v341_v10 }
  0x5b   :  { %324 = vmatmul.mubr.msk.bf16.vlgmr.msra.gmra.mrb[4].mxu0 %vm96_vm1, %v196_v12 }
 0x126   :  { %v134_v13 = vpop.f32.mrb[0].mxu0  ;;  %v189_v15 = vpop.f32.mrb[0].mxu1 }
 0x127   :  { %v309_v14 = vpop.f32.mrb[1].mxu0  ;;  %v190_v16 = vadd.f32 %v189_v15, %v134_v13  ;;  %v317_v18 = vpop.f32.mrb[1].mxu1 }
 0x128   :  { %v137_v17 = vpop.f32.mrb[2].mxu0  ;;  %v192_v20 = vpop.f32.mrb[2].mxu1 }
 0x129   :  { %v310_v19 = vpop.f32.mrb[3].mxu0  ;;  %v318_v21 = vpop.f32.mrb[3].mxu1 }
 0x12e   :  { %v251_v22 = vpop.f32.mrb[4].mxu0 }
 0x12f   :  { %v257_v24 = vadd.f32 %v251_v22, %v190_v16  ;;  %v325_v25 = vpop.f32.mrb[5].mxu0 }
 0x130   :  { %v254_v26 = vpop.f32.mrb[6].mxu0 }
 0x131   :  { %v265_v27 = vadd.f32 %v293_v23, %v257_v24  ;;  %v326_v28 = vpop.f32.mrb[7].mxu0 }
 0x133   :  { %266 = vst.msk [vmem:[#allocation10] sm:$0xff] %vm96_vm1, %v265_v27 }
 0x134   :  { %441 = shalt.err (!%p438_p8)
}
 0x135   :  { %s442_s4 = scalar_lea.hbm %s581_s5, 128 }
 0x136   :  { %p443_p9 = scmp.ne.s32.totalorder %s581_s5, %s442_s4  ;;  %p446_p10 = scmp.lt.u32.totalorder %s442_s4, %s581_s5 }
 0x138   :  { %p448_p11 = pnand %p446_p10, %p443_p9 }
 0x13a   :  { %451 = shalt.err (!%p448_p11)
}
 0x13b   :  { %276 = dma.vmem_to_hbm [thread:$0]  %s274_s16, 128, %s581_s5, [#allocation4]  }
 0x13c   :  { %458 = dma.done.wait [#allocation4], 128  }
 0x13d   :  { %459 = vsyncadd [#allocation4], 4294967168 }
 0x13e   :  { %280 = vsyncpa [#allocation3], 1 }
 0x13f   :  { %281 = vsyncpa [#allocation6], 1 }
 0x140   :  { %282 = vsyncpa [#allocation9], 1 }
 0x141   :  { %283 = vsyncpa [#allocation4], 1 }

</bundles_post_ra>
